<compile_context>
chip_gen: v6e
topology: v6e:2x2x1
jax: 0.10.0
libtpu: 0.0.40
codegen_flags: <defaults>
</compile_context>

<pallas_src>
import functools

import jax
import jax.numpy as jnp
import numpy as np
from jax.experimental import pallas as pl
from jax.experimental.pallas import tpu as pltpu


def _round_up(x, m):
    return (x + m - 1) // m * m


def _lstm_chunk_kernel(n_layers, hidden_size, tile_t, bt_rows, *refs):
    # refs = (x_ref, [wih_t, whh_t, b] * n_layers, wdec_t, bdec, out_ref,
    #         xproj_scr, hs_scr, h_scr, c_scr)
    x_ref = refs[0]
    layer_refs = refs[1 : 1 + 3 * n_layers]
    wdec_ref = refs[1 + 3 * n_layers]
    bdec_ref = refs[2 + 3 * n_layers]
    out_ref = refs[3 + 3 * n_layers]
    xproj_scr = refs[4 + 3 * n_layers]   # (tile_t*bt_rows, 4H) gate pre-activations
    hs_scr = refs[5 + 3 * n_layers]      # (tile_t*bt_rows, H) current layer's outputs
    h_scr = refs[6 + 3 * n_layers]       # (n_layers, bt_rows, H) carried hidden state
    c_scr = refs[7 + 3 * n_layers]       # (n_layers, bt_rows, H) carried cell state

    H = hidden_size

    # First time chunk of this batch tile: zero the carried state.
    @pl.when(pl.program_id(1) == 0)
    def _():
        h_scr[...] = jnp.zeros_like(h_scr)
        c_scr[...] = jnp.zeros_like(c_scr)

    for l in range(n_layers):
        wih_ref = layer_refs[3 * l]       # (in_dim, 4H)  gate order (i, f, o, g)
        whh_ref = layer_refs[3 * l + 1]   # (H, 4H)
        b_ref = layer_refs[3 * l + 2]     # (1, 4H) = b_ih + b_hh

        # Hoisted input projection for the whole chunk: one large MXU matmul,
        # bias folded in once (not broadcast per timestep).
        layer_in = x_ref[...] if l == 0 else hs_scr[...]
        wih = wih_ref[...]
        xproj_scr[...] = (
            jnp.dot(layer_in.astype(wih.dtype), wih, preferred_element_type=jnp.float32)
            + b_ref[...]
        )

        h0 = h_scr[l]  # (bt_rows, H)
        c0 = c_scr[l]

        def step(t, carry, whh_ref=whh_ref):
            h, c = carry
            row0 = pl.multiple_of(t * bt_rows, 8)  # bt_rows % 8 == 0 -> aligned slice
            # Stream Whh from VMEM each step instead of holding it live in vregs
            # across the whole fori_loop (avoids spills at realistic H).
            gates = xproj_scr[pl.ds(row0, bt_rows), :] + jnp.dot(
                h, whh_ref[...], preferred_element_type=jnp.float32
            )  # (bt_rows, 4H), gate order (i, f, o, g)

            # One sigmoid pass over the contiguous (i, f, o) block, one tanh over g.
            sig = jax.nn.sigmoid(gates[:, : 3 * H])
            g_g = jnp.tanh(gates[:, 3 * H :])
            i_g = sig[:, 0 * H : 1 * H]
            f_g = sig[:, 1 * H : 2 * H]
            o_g = sig[:, 2 * H : 3 * H]

            c_new = f_g * c + i_g * g_g
            h_new = o_g * jnp.tanh(c_new)
            hs_scr[pl.ds(row0, bt_rows), :] = h_new
            return (h_new, c_new)

        h_fin, c_fin = jax.lax.fori_loop(0, tile_t, step, (h0, c0))
        h_scr[l] = h_fin
        c_scr[l] = c_fin

    # Decoder: one big matmul + one lane-dense (multiple-of-128) store per chunk.
    wdec = wdec_ref[...]
    out_ref[...] = (
        jnp.dot(hs_scr[...].astype(wdec.dtype), wdec, preferred_element_type=jnp.float32)
        + bdec_ref[...]
    ).astype(out_ref.dtype)


def _reorder_gate_cols(w, H):
    """PyTorch LSTM gate order along the last axis is (i, f, g, o); reorder to (i, f, o, g)."""
    i, f, g, o = (w[..., k * H : (k + 1) * H] for k in range(4))
    return jnp.concatenate([i, f, o, g], axis=-1)


def _const_spec(shape):
    """BlockSpec for grid-invariant weights/biases: single-buffered (no double-buffer copy)."""
    zeros = (0,) * len(shape)
    try:
        return pl.BlockSpec(shape, lambda bt, c: zeros, pipeline_mode=pl.Buffered(1))
    except TypeError:  # older JAX without pipeline_mode on BlockSpec
        return pl.BlockSpec(shape, lambda bt, c: zeros)


def _derive_tile_t(T, bt_rows, E, H, O_pad, n_layers, budget_bytes):
    """Largest time-chunk whose per-chunk VMEM footprint fits the budget."""
    # Per-timestep rows: x block (x2 buffers) + out block (x2) + xproj scratch + hs scratch.
    per_t = bt_rows * 4 * (2 * E + 2 * O_pad + 4 * H + H)
    # Constants: weights/biases (x2 safety in case single-buffering is unavailable) + carried state.
    const = 4 * (
        2 * sum((E if l == 0 else H) * 4 * H + H * 4 * H + 4 * H for l in range(n_layers))
        + 2 * (H * O_pad + O_pad)
        + 2 * n_layers * bt_rows * H
    )
    avail = max(budget_bytes - const, per_t)
    return int(max(1, min(avail // per_t, T)))


def next_character_lstm_forward(
    tokens,
    params,
    *,
    n_layers,
    hidden_size,
    batch_tiles=None,
    tile_t=None,
    matmul_dtype=jnp.float32,       # set to jnp.bfloat16 to speed up non-recurrent matmuls
    vmem_budget_bytes=40 * 1024 * 1024,
):
    """tokens: (B, T) int32. Returns logits (B, output_size, T) like the PyTorch module."""
    embed_table = params["embed"]                       # (vocab, E)
    wdec_full = params["wdec_t"]                        # (H, O)
    bdec = params["bdec"]                               # (1, O)

    B, T = tokens.shape
    E = embed_table.shape[1]
    H = hidden_size
    O = wdec_full.shape[1]

    # --- batch-tile (parallel) grid axis: use v7x's 2nd TensorCore when batch allows. ---
    if batch_tiles is None:
        kind = jax.devices()[0].device_kind.lower()
        batch_tiles = 2 if ("v7" in kind and B >= 16) else 1
    batch_tiles = max(1, min(batch_tiles, max(1, B // 8)))
    B_pad = _round_up(B, 8 * batch_tiles)
    bt_rows = B_pad // batch_tiles                       # rows per batch tile (multiple of 8)

    O_pad = _round_up(O, 128)                            # lane-dense decoder store

    if tile_t is None:
        tile_t = _derive_tile_t(T, bt_rows, E, H, O_pad, n_layers, vmem_budget_bytes)
    TILE_T = max(1, min(tile_t, T))
    T_pad = _round_up(T, TILE_T)
    n_chunks = T_pad // TILE_T
    CHUNK_ROWS = TILE_T * bt_rows

    # Embedding lookup (gather) as XLA glue; lay rows out as
    # row = ((bt * T_pad) + t) * bt_rows + b  so every (batch-tile, chunk) block is contiguous.
    tok_p = jnp.pad(tokens, ((0, B_pad - B), (0, T_pad - T)))             # (B_pad, T_pad), pads -> token 0
    tok_tm = jnp.transpose(tok_p.reshape(batch_tiles, bt_rows, T_pad), (0, 2, 1))  # (nbt, T_pad, bt_rows)
    encoded = jnp.take(embed_table, tok_tm, axis=0)                       # (nbt, T_pad, bt_rows, E)
    x2d = encoded.reshape(batch_tiles * T_pad * bt_rows, E)

    # Decoder weights: pad output columns to a multiple of 128.
    wdec_pad = jnp.pad(wdec_full.astype(matmul_dtype), ((0, 0), (0, O_pad - O)))   # (H, O_pad)
    bdec_pad = jnp.pad(bdec, ((0, 0), (0, O_pad - O)))                             # (1, O_pad)

    flat_layer_args = []
    layer_specs = []
    for l in range(n_layers):
        wih_t = _reorder_gate_cols(params[f"wih_t_{l}"], H).astype(matmul_dtype)  # (in_dim, 4H)
        whh_t = _reorder_gate_cols(params[f"whh_t_{l}"], H)                        # (H, 4H) keep f32
        b = _reorder_gate_cols(params[f"b_{l}"], H)                                # (1, 4H)
        flat_layer_args += [wih_t, whh_t, b]
        layer_specs += [_const_spec(wih_t.shape), _const_spec(whh_t.shape), _const_spec(b.shape)]

    kernel = functools.partial(_lstm_chunk_kernel, n_layers, H, TILE_T, bt_rows)

    out2d = pl.pallas_call(
        kernel,
        out_shape=jax.ShapeDtypeStruct((batch_tiles * T_pad * bt_rows, O_pad), jnp.float32),
        grid_spec=pltpu.PrefetchScalarGridSpec(
            num_scalar_prefetch=0,
            grid=(batch_tiles, n_chunks),
            in_specs=[pl.BlockSpec((CHUNK_ROWS, E), lambda bt, c: (bt * n_chunks + c, 0))]
            + layer_specs
            + [_const_spec(wdec_pad.shape), _const_spec(bdec_pad.shape)],
            out_specs=pl.BlockSpec((CHUNK_ROWS, O_pad), lambda bt, c: (bt * n_chunks + c, 0)),
            scratch_shapes=[
                pltpu.VMEM((CHUNK_ROWS, 4 * H), jnp.float32),    # gate pre-activations (chunk)
                pltpu.VMEM((CHUNK_ROWS, H), jnp.float32),        # per-chunk hidden outputs
                pltpu.VMEM((n_layers, bt_rows, H), jnp.float32), # carried h state
                pltpu.VMEM((n_layers, bt_rows, H), jnp.float32), # carried c state
            ],
        ),
        compiler_params=pltpu.CompilerParams(
            # batch tiles are independent (megacore); time chunks carry state -> sequential
            dimension_semantics=("parallel", "arbitrary"),
            # fits v7x's 64 MiB physical VMEM, raises v5e's 16 MiB scoped default
            vmem_limit_bytes=56 * 1024 * 1024,
        ),
    )(x2d, *flat_layer_args, wdec_pad, bdec_pad)

    # Un-tile / un-pad and match PyTorch: output.permute(0, 2, 1) => (B, O, T)
    out = out2d.reshape(batch_tiles, T_pad, bt_rows, O_pad)[:, :T, :, :O]
    out = jnp.transpose(out, (0, 2, 3, 1)).reshape(B_pad, O, T)[:B]
    return out


def init_params(key, input_size, embed_size, hidden_size, output_size, n_layers):
    """Deterministic synthetic parameters (same shapes / gate order as the PyTorch module)."""
    params = {}
    k = 1.0 / np.sqrt(hidden_size)
    keys = jax.random.split(key, 3 + 4 * n_layers)
    params["embed"] = jax.random.normal(keys[0], (input_size, embed_size), jnp.float32)
    for l in range(n_layers):
        in_dim = embed_size if l == 0 else hidden_size
        kw = keys[3 + 4 * l : 3 + 4 * (l + 1)]
        w_ih = jax.random.uniform(kw[0], (4 * hidden_size, in_dim), jnp.float32, -k, k)
        w_hh = jax.random.uniform(kw[1], (4 * hidden_size, hidden_size), jnp.float32, -k, k)
        b_ih = jax.random.uniform(kw[2], (4 * hidden_size,), jnp.float32, -k, k)
        b_hh = jax.random.uniform(kw[3], (4 * hidden_size,), jnp.float32, -k, k)
        params[f"wih_t_{l}"] = w_ih.T                      # (in_dim, 4H), PyTorch order (i,f,g,o)
        params[f"whh_t_{l}"] = w_hh.T                      # (H, 4H)
        params[f"b_{l}"] = (b_ih + b_hh).reshape(1, -1)    # (1, 4H)
    w_dec = jax.random.uniform(keys[1], (output_size, hidden_size), jnp.float32, -k, k)
    b_dec = jax.random.uniform(keys[2], (output_size,), jnp.float32, -k, k)
    params["wdec_t"] = w_dec.T                             # (H, O)
    params["bdec"] = b_dec.reshape(1, -1)                  # (1, O)
    return params


def _reference_forward(tokens, params, *, n_layers, hidden_size):
    """Pure-JAX reference (mirrors PyTorch semantics) for a sanity check."""
    H = hidden_size
    x = jnp.take(params["embed"], tokens, axis=0)  # (B, T, E)
    B = x.shape[0]
    for l in range(n_layers):
        wih_t = params[f"wih_t_{l}"]
        whh_t = params[f"whh_t_{l}"]
        b = params[f"b_{l}"]

        def step(carry, xt, wih_t=wih_t, whh_t=whh_t, b=b):
            h, c = carry
            gates = xt @ wih_t + h @ whh_t + b
            i = jax.nn.sigmoid(gates[:, 0 * H : 1 * H])
            f = jax.nn.sigmoid(gates[:, 1 * H : 2 * H])
            g = jnp.tanh(gates[:, 2 * H : 3 * H])
            o = jax.nn.sigmoid(gates[:, 3 * H : 4 * H])
            c = f * c + i * g
            h = o * jnp.tanh(c)
            return (h, c), h

        init = (jnp.zeros((B, H), jnp.float32), jnp.zeros((B, H), jnp.float32))
        _, hs = jax.lax.scan(step, init, jnp.transpose(x, (1, 0, 2)))
        x = jnp.transpose(hs, (1, 0, 2))  # (B, T, H)
    out = x @ params["wdec_t"] + params["bdec"]  # (B, T, O)
    return jnp.transpose(out, (0, 2, 1))         # (B, O, T)


if __name__ == "__main__":
    # Small shapes consistent with the module: vocab=32, embed=16, hidden=32, output=32, 2 layers.
    input_size = 32
    embed_size = 16
    hidden_size = 32
    output_size = 32
    n_layers = 2
    batch = 2
    seq_len = 8

    key = jax.random.PRNGKey(0)
    pkey, tkey = jax.random.split(key)
    params = init_params(pkey, input_size, embed_size, hidden_size, output_size, n_layers)
    tokens = jax.random.randint(tkey, (batch, seq_len), 0, input_size, dtype=jnp.int32)

    out = next_character_lstm_forward(
        tokens, params, n_layers=n_layers, hidden_size=hidden_size
    )
    out = jax.block_until_ready(out)
    assert out.shape == (batch, output_size, seq_len), out.shape

    ref = jax.block_until_ready(
        _reference_forward(tokens, params, n_layers=n_layers, hidden_size=hidden_size)
    )
    np.testing.assert_allclose(np.asarray(out), np.asarray(ref), rtol=1e-4, atol=1e-4)

    print("KERNEL_OK")
</pallas_src>

<mosaic_0001>
module attributes {stable_mosaic.version = 11 : i64} {
  func.func @_lstm_chunk_kernel(%arg0: i32, %arg1: i32, %arg2: memref<64x16xf32, #tpu.memory_space<vmem>>, %arg3: memref<16x128xf32, #tpu.memory_space<vmem>>, %arg4: memref<32x128xf32, #tpu.memory_space<vmem>>, %arg5: memref<1x128xf32, #tpu.memory_space<vmem>>, %arg6: memref<32x128xf32, #tpu.memory_space<vmem>>, %arg7: memref<32x128xf32, #tpu.memory_space<vmem>>, %arg8: memref<1x128xf32, #tpu.memory_space<vmem>>, %arg9: memref<32x128xf32, #tpu.memory_space<vmem>>, %arg10: memref<1x128xf32, #tpu.memory_space<vmem>>, %arg11: memref<64x128xf32, #tpu.memory_space<vmem>>, %arg12: memref<64x128xf32, #tpu.memory_space<vmem>>, %arg13: memref<64x32xf32, #tpu.memory_space<vmem>>, %arg14: memref<2x8x32xf32, #tpu.memory_space<vmem>>, %arg15: memref<2x8x32xf32, #tpu.memory_space<vmem>>) attributes {dimension_semantics = [#tpu.dimension_semantics<parallel>, #tpu.dimension_semantics<arbitrary>], iteration_bounds = array<i64: 1, 1>, scalar_prefetch = 0 : i64, scratch_operands = 4 : i64, tpu.core_type = #tpu.core_type<tc>, window_params = [{transform_indices = @transform_0, window_bounds = array<i64: 64, 16>}, {pipeline_mode = #tpu.pipeline_mode<synchronous>, transform_indices = @transform_1, window_bounds = array<i64: 16, 128>}, {pipeline_mode = #tpu.pipeline_mode<synchronous>, transform_indices = @transform_2, window_bounds = array<i64: 32, 128>}, {pipeline_mode = #tpu.pipeline_mode<synchronous>, transform_indices = @transform_3, window_bounds = array<i64: 1, 128>}, {pipeline_mode = #tpu.pipeline_mode<synchronous>, transform_indices = @transform_4, window_bounds = array<i64: 32, 128>}, {pipeline_mode = #tpu.pipeline_mode<synchronous>, transform_indices = @transform_5, window_bounds = array<i64: 32, 128>}, {pipeline_mode = #tpu.pipeline_mode<synchronous>, transform_indices = @transform_6, window_bounds = array<i64: 1, 128>}, {pipeline_mode = #tpu.pipeline_mode<synchronous>, transform_indices = @transform_7, window_bounds = array<i64: 32, 128>}, {pipeline_mode = #tpu.pipeline_mode<synchronous>, transform_indices = @transform_8, window_bounds = array<i64: 1, 128>}, {transform_indices = @transform_9, window_bounds = array<i64: 64, 128>}]} {
    %c0_i32 = arith.constant 0 : i32
    %0 = arith.cmpi eq, %arg1, %c0_i32 : i32
    %1 = arith.extui %0 : i1 to i32
    %c0_i32_0 = arith.constant 0 : i32
    %2 = arith.cmpi ne, %1, %c0_i32_0 : i32
    scf.if %2 {
      %cst_55 = arith.constant 0.000000e+00 : f32
      %48 = vector.broadcast %cst_55 : f32 to vector<2x8x32xf32>
      %c0_56 = arith.constant 0 : index
      %c0_57 = arith.constant 0 : index
      %c0_58 = arith.constant 0 : index
      %49 = vector.load %arg14[%c0_56, %c0_57, %c0_58] : memref<2x8x32xf32, #tpu.memory_space<vmem>>, vector<2x8x32xf32>
      tpu.vector_store %arg14[%c0_56, %c0_57, %c0_58], %48 {strides = array<i32>} : memref<2x8x32xf32, #tpu.memory_space<vmem>>, vector<2x8x32xf32>,
      %cst_59 = arith.constant 0.000000e+00 : f32
      %50 = vector.broadcast %cst_59 : f32 to vector<2x8x32xf32>
      %c0_60 = arith.constant 0 : index
      %c0_61 = arith.constant 0 : index
      %c0_62 = arith.constant 0 : index
      %51 = vector.load %arg15[%c0_60, %c0_61, %c0_62] : memref<2x8x32xf32, #tpu.memory_space<vmem>>, vector<2x8x32xf32>
      tpu.vector_store %arg15[%c0_60, %c0_61, %c0_62], %50 {strides = array<i32>} : memref<2x8x32xf32, #tpu.memory_space<vmem>>, vector<2x8x32xf32>,
    } else {
    }
    %c0 = arith.constant 0 : index
    %c0_1 = arith.constant 0 : index
    %3 = vector.load %arg2[%c0, %c0_1] : memref<64x16xf32, #tpu.memory_space<vmem>>, vector<64x16xf32>
    %c0_2 = arith.constant 0 : index
    %c0_3 = arith.constant 0 : index
    %4 = vector.load %arg3[%c0_2, %c0_3] : memref<16x128xf32, #tpu.memory_space<vmem>>, vector<16x128xf32>
    %cst = arith.constant dense<0.000000e+00> : vector<64x128xf32>
    %5 = tpu.matmul %3, %4, %cst {dimension_numbers = #tpu.dot_dimension_numbers<[1], [0], [0], [1], [0, 0, 1, 1], [], []>} : vector<64x16xf32>, vector<16x128xf32>, vector<64x128xf32> -> vector<64x128xf32>
    %c0_4 = arith.constant 0 : index
    %c0_5 = arith.constant 0 : index
    %6 = vector.load %arg5[%c0_4, %c0_5] : memref<1x128xf32, #tpu.memory_space<vmem>>, vector<1x128xf32>
    %7 = vector.broadcast %6 : vector<1x128xf32> to vector<64x128xf32>
    %8 = arith.addf %5, %7 : vector<64x128xf32>
    %c0_6 = arith.constant 0 : index
    %c0_7 = arith.constant 0 : index
    %9 = vector.load %arg12[%c0_6, %c0_7] : memref<64x128xf32, #tpu.memory_space<vmem>>, vector<64x128xf32>
    tpu.vector_store %arg12[%c0_6, %c0_7], %8 {strides = array<i32>} : memref<64x128xf32, #tpu.memory_space<vmem>>, vector<64x128xf32>,
    %c0_8 = arith.constant 0 : index
    %c0_9 = arith.constant 0 : index
    %c0_10 = arith.constant 0 : index
    %10 = vector.load %arg14[%c0_8, %c0_9, %c0_10] : memref<2x8x32xf32, #tpu.memory_space<vmem>>, vector<1x8x32xf32>
    %11 = vector.shape_cast %10 : vector<1x8x32xf32> to vector<8x32xf32>
    %c0_11 = arith.constant 0 : index
    %c0_12 = arith.constant 0 : index
    %c0_13 = arith.constant 0 : index
    %12 = vector.load %arg15[%c0_11, %c0_12, %c0_13] : memref<2x8x32xf32, #tpu.memory_space<vmem>>, vector<1x8x32xf32>
    %13 = vector.shape_cast %12 : vector<1x8x32xf32> to vector<8x32xf32>
    %c0_i32_14 = arith.constant 0 : i32
    %c8_i32 = arith.constant 8 : i32
    %14 = arith.addi %c0_i32_14, %c8_i32 : i32
    %c1_i32 = arith.constant 1 : i32
    %15:2 = scf.for %arg16 = %c0_i32_14 to %14 step %c1_i32 iter_args(%arg17 = %11, %arg18 = %13) -> (vector<8x32xf32>, vector<8x32xf32>)  : i32 {
      %c8_i32_55 = arith.constant 8 : i32
      %48 = arith.muli %arg16, %c8_i32_55 : i32
      %49 = tpu.assume_multiple %48, 8 : i32
      %50 = arith.index_cast %49 : i32 to index
      %c0_56 = arith.constant 0 : index
      %51 = vector.load %arg12[%50, %c0_56] : memref<64x128xf32, #tpu.memory_space<vmem>>, vector<8x128xf32>
      %c0_57 = arith.constant 0 : index
      %c0_58 = arith.constant 0 : index
      %52 = vector.load %arg4[%c0_57, %c0_58] : memref<32x128xf32, #tpu.memory_space<vmem>>, vector<32x128xf32>
      %cst_59 = arith.constant dense<0.000000e+00> : vector<8x128xf32>
      %53 = tpu.matmul %arg17, %52, %cst_59 {dimension_numbers = #tpu.dot_dimension_numbers<[1], [0], [0], [1], [0, 0, 1, 1], [], []>} : vector<8x32xf32>, vector<32x128xf32>, vector<8x128xf32> -> vector<8x128xf32>
      %54 = arith.addf %51, %53 : vector<8x128xf32>
      %55 = vector.extract_strided_slice %54 {offsets = [0, 0], sizes = [8, 96], strides = [1, 1]} : vector<8x128xf32> to vector<8x96xf32>
      %56 = arith.negf %55 : vector<8x96xf32>
      %57 = math.exp %56 : vector<8x96xf32>
      %cst_60 = arith.constant 1.000000e+00 : f32
      %58 = vector.broadcast %cst_60 : f32 to vector<8x96xf32>
      %59 = arith.addf %58, %57 : vector<8x96xf32>
      %60 = arith.divf %58, %59 : vector<8x96xf32>
      %61 = vector.extract_strided_slice %54 {offsets = [0, 96], sizes = [8, 32], strides = [1, 1]} : vector<8x128xf32> to vector<8x32xf32>
      %62 = math.tanh %61 : vector<8x32xf32>
      %63 = vector.extract_strided_slice %60 {offsets = [0, 0], sizes = [8, 32], strides = [1, 1]} : vector<8x96xf32> to vector<8x32xf32>
      %64 = vector.extract_strided_slice %60 {offsets = [0, 32], sizes = [8, 32], strides = [1, 1]} : vector<8x96xf32> to vector<8x32xf32>
      %65 = vector.extract_strided_slice %60 {offsets = [0, 64], sizes = [8, 32], strides = [1, 1]} : vector<8x96xf32> to vector<8x32xf32>
      %66 = arith.mulf %64, %arg18 : vector<8x32xf32>
      %67 = arith.mulf %63, %62 : vector<8x32xf32>
      %68 = arith.addf %66, %67 : vector<8x32xf32>
      %69 = math.tanh %68 : vector<8x32xf32>
      %70 = arith.mulf %65, %69 : vector<8x32xf32>
      %71 = arith.index_cast %49 : i32 to index
      %c0_61 = arith.constant 0 : index
      %72 = vector.load %arg13[%71, %c0_61] : memref<64x32xf32, #tpu.memory_space<vmem>>, vector<8x32xf32>
      tpu.vector_store %arg13[%71, %c0_61], %70 {strides = array<i32>} : memref<64x32xf32, #tpu.memory_space<vmem>>, vector<8x32xf32>,
      scf.yield %70, %68 : vector<8x32xf32>, vector<8x32xf32>
    }
    %c8_i32_15 = arith.constant 8 : i32
    %c0_16 = arith.constant 0 : index
    %c0_17 = arith.constant 0 : index
    %c0_18 = arith.constant 0 : index
    %16 = vector.load %arg14[%c0_16, %c0_17, %c0_18] : memref<2x8x32xf32, #tpu.memory_space<vmem>>, vector<1x8x32xf32>
    %17 = vector.shape_cast %16 : vector<1x8x32xf32> to vector<8x32xf32>
    %18 = vector.shape_cast %15#0 : vector<8x32xf32> to vector<1x8x32xf32>
    tpu.vector_store %arg14[%c0_16, %c0_17, %c0_18], %18 {strides = array<i32>} : memref<2x8x32xf32, #tpu.memory_space<vmem>>, vector<1x8x32xf32>,
    %c0_19 = arith.constant 0 : index
    %c0_20 = arith.constant 0 : index
    %c0_21 = arith.constant 0 : index
    %19 = vector.load %arg15[%c0_19, %c0_20, %c0_21] : memref<2x8x32xf32, #tpu.memory_space<vmem>>, vector<1x8x32xf32>
    %20 = vector.shape_cast %19 : vector<1x8x32xf32> to vector<8x32xf32>
    %21 = vector.shape_cast %15#1 : vector<8x32xf32> to vector<1x8x32xf32>
    tpu.vector_store %arg15[%c0_19, %c0_20, %c0_21], %21 {strides = array<i32>} : memref<2x8x32xf32, #tpu.memory_space<vmem>>, vector<1x8x32xf32>,
    %c0_22 = arith.constant 0 : index
    %c0_23 = arith.constant 0 : index
    %22 = vector.load %arg13[%c0_22, %c0_23] : memref<64x32xf32, #tpu.memory_space<vmem>>, vector<64x32xf32>
    %c0_24 = arith.constant 0 : index
    %c0_25 = arith.constant 0 : index
    %23 = vector.load %arg6[%c0_24, %c0_25] : memref<32x128xf32, #tpu.memory_space<vmem>>, vector<32x128xf32>
    %cst_26 = arith.constant dense<0.000000e+00> : vector<64x128xf32>
    %24 = tpu.matmul %22, %23, %cst_26 {dimension_numbers = #tpu.dot_dimension_numbers<[1], [0], [0], [1], [0, 0, 1, 1], [], []>} : vector<64x32xf32>, vector<32x128xf32>, vector<64x128xf32> -> vector<64x128xf32>
    %c0_27 = arith.constant 0 : index
    %c0_28 = arith.constant 0 : index
    %25 = vector.load %arg8[%c0_27, %c0_28] : memref<1x128xf32, #tpu.memory_space<vmem>>, vector<1x128xf32>
    %26 = vector.broadcast %25 : vector<1x128xf32> to vector<64x128xf32>
    %27 = arith.addf %24, %26 : vector<64x128xf32>
    %c0_29 = arith.constant 0 : index
    %c0_30 = arith.constant 0 : index
    %28 = vector.load %arg12[%c0_29, %c0_30] : memref<64x128xf32, #tpu.memory_space<vmem>>, vector<64x128xf32>
    tpu.vector_store %arg12[%c0_29, %c0_30], %27 {strides = array<i32>} : memref<64x128xf32, #tpu.memory_space<vmem>>, vector<64x128xf32>,
    %c1 = arith.constant 1 : index
    %c0_31 = arith.constant 0 : index
    %c0_32 = arith.constant 0 : index
    %29 = vector.load %arg14[%c1, %c0_31, %c0_32] : memref<2x8x32xf32, #tpu.memory_space<vmem>>, vector<1x8x32xf32>
    %30 = vector.shape_cast %29 : vector<1x8x32xf32> to vector<8x32xf32>
    %c1_33 = arith.constant 1 : index
    %c0_34 = arith.constant 0 : index
    %c0_35 = arith.constant 0 : index
    %31 = vector.load %arg15[%c1_33, %c0_34, %c0_35] : memref<2x8x32xf32, #tpu.memory_space<vmem>>, vector<1x8x32xf32>
    %32 = vector.shape_cast %31 : vector<1x8x32xf32> to vector<8x32xf32>
    %c0_i32_36 = arith.constant 0 : i32
    %c8_i32_37 = arith.constant 8 : i32
    %33 = arith.addi %c0_i32_36, %c8_i32_37 : i32
    %c1_i32_38 = arith.constant 1 : i32
    %34:2 = scf.for %arg16 = %c0_i32_36 to %33 step %c1_i32_38 iter_args(%arg17 = %30, %arg18 = %32) -> (vector<8x32xf32>, vector<8x32xf32>)  : i32 {
      %c8_i32_55 = arith.constant 8 : i32
      %48 = arith.muli %arg16, %c8_i32_55 : i32
      %49 = tpu.assume_multiple %48, 8 : i32
      %50 = arith.index_cast %49 : i32 to index
      %c0_56 = arith.constant 0 : index
      %51 = vector.load %arg12[%50, %c0_56] : memref<64x128xf32, #tpu.memory_space<vmem>>, vector<8x128xf32>
      %c0_57 = arith.constant 0 : index
      %c0_58 = arith.constant 0 : index
      %52 = vector.load %arg7[%c0_57, %c0_58] : memref<32x128xf32, #tpu.memory_space<vmem>>, vector<32x128xf32>
      %cst_59 = arith.constant dense<0.000000e+00> : vector<8x128xf32>
      %53 = tpu.matmul %arg17, %52, %cst_59 {dimension_numbers = #tpu.dot_dimension_numbers<[1], [0], [0], [1], [0, 0, 1, 1], [], []>} : vector<8x32xf32>, vector<32x128xf32>, vector<8x128xf32> -> vector<8x128xf32>
      %54 = arith.addf %51, %53 : vector<8x128xf32>
      %55 = vector.extract_strided_slice %54 {offsets = [0, 0], sizes = [8, 96], strides = [1, 1]} : vector<8x128xf32> to vector<8x96xf32>
      %56 = arith.negf %55 : vector<8x96xf32>
      %57 = math.exp %56 : vector<8x96xf32>
      %cst_60 = arith.constant 1.000000e+00 : f32
      %58 = vector.broadcast %cst_60 : f32 to vector<8x96xf32>
      %59 = arith.addf %58, %57 : vector<8x96xf32>
      %60 = arith.divf %58, %59 : vector<8x96xf32>
      %61 = vector.extract_strided_slice %54 {offsets = [0, 96], sizes = [8, 32], strides = [1, 1]} : vector<8x128xf32> to vector<8x32xf32>
      %62 = math.tanh %61 : vector<8x32xf32>
      %63 = vector.extract_strided_slice %60 {offsets = [0, 0], sizes = [8, 32], strides = [1, 1]} : vector<8x96xf32> to vector<8x32xf32>
      %64 = vector.extract_strided_slice %60 {offsets = [0, 32], sizes = [8, 32], strides = [1, 1]} : vector<8x96xf32> to vector<8x32xf32>
      %65 = vector.extract_strided_slice %60 {offsets = [0, 64], sizes = [8, 32], strides = [1, 1]} : vector<8x96xf32> to vector<8x32xf32>
      %66 = arith.mulf %64, %arg18 : vector<8x32xf32>
      %67 = arith.mulf %63, %62 : vector<8x32xf32>
      %68 = arith.addf %66, %67 : vector<8x32xf32>
      %69 = math.tanh %68 : vector<8x32xf32>
      %70 = arith.mulf %65, %69 : vector<8x32xf32>
      %71 = arith.index_cast %49 : i32 to index
      %c0_61 = arith.constant 0 : index
      %72 = vector.load %arg13[%71, %c0_61] : memref<64x32xf32, #tpu.memory_space<vmem>>, vector<8x32xf32>
      tpu.vector_store %arg13[%71, %c0_61], %70 {strides = array<i32>} : memref<64x32xf32, #tpu.memory_space<vmem>>, vector<8x32xf32>,
      scf.yield %70, %68 : vector<8x32xf32>, vector<8x32xf32>
    }
    %c8_i32_39 = arith.constant 8 : i32
    %c1_40 = arith.constant 1 : index
    %c0_41 = arith.constant 0 : index
    %c0_42 = arith.constant 0 : index
    %35 = vector.load %arg14[%c1_40, %c0_41, %c0_42] : memref<2x8x32xf32, #tpu.memory_space<vmem>>, vector<1x8x32xf32>
    %36 = vector.shape_cast %35 : vector<1x8x32xf32> to vector<8x32xf32>
    %37 = vector.shape_cast %34#0 : vector<8x32xf32> to vector<1x8x32xf32>
    tpu.vector_store %arg14[%c1_40, %c0_41, %c0_42], %37 {strides = array<i32>} : memref<2x8x32xf32, #tpu.memory_space<vmem>>, vector<1x8x32xf32>,
    %c1_43 = arith.constant 1 : index
    %c0_44 = arith.constant 0 : index
    %c0_45 = arith.constant 0 : index
    %38 = vector.load %arg15[%c1_43, %c0_44, %c0_45] : memref<2x8x32xf32, #tpu.memory_space<vmem>>, vector<1x8x32xf32>
    %39 = vector.shape_cast %38 : vector<1x8x32xf32> to vector<8x32xf32>
    %40 = vector.shape_cast %34#1 : vector<8x32xf32> to vector<1x8x32xf32>
    tpu.vector_store %arg15[%c1_43, %c0_44, %c0_45], %40 {strides = array<i32>} : memref<2x8x32xf32, #tpu.memory_space<vmem>>, vector<1x8x32xf32>,
    %c0_46 = arith.constant 0 : index
    %c0_47 = arith.constant 0 : index
    %41 = vector.load %arg9[%c0_46, %c0_47] : memref<32x128xf32, #tpu.memory_space<vmem>>, vector<32x128xf32>
    %c0_48 = arith.constant 0 : index
    %c0_49 = arith.constant 0 : index
    %42 = vector.load %arg13[%c0_48, %c0_49] : memref<64x32xf32, #tpu.memory_space<vmem>>, vector<64x32xf32>
    %cst_50 = arith.constant dense<0.000000e+00> : vector<64x128xf32>
    %43 = tpu.matmul %42, %41, %cst_50 {dimension_numbers = #tpu.dot_dimension_numbers<[1], [0], [0], [1], [0, 0, 1, 1], [], []>} : vector<64x32xf32>, vector<32x128xf32>, vector<64x128xf32> -> vector<64x128xf32>
    %c0_51 = arith.constant 0 : index
    %c0_52 = arith.constant 0 : index
    %44 = vector.load %arg10[%c0_51, %c0_52] : memref<1x128xf32, #tpu.memory_space<vmem>>, vector<1x128xf32>
    %45 = vector.broadcast %44 : vector<1x128xf32> to vector<64x128xf32>
    %46 = arith.addf %43, %45 : vector<64x128xf32>
    %c0_53 = arith.constant 0 : index
    %c0_54 = arith.constant 0 : index
    %47 = vector.load %arg11[%c0_53, %c0_54] : memref<64x128xf32, #tpu.memory_space<vmem>>, vector<64x128xf32>
    tpu.vector_store %arg11[%c0_53, %c0_54], %46 {strides = array<i32>} : memref<64x128xf32, #tpu.memory_space<vmem>>, vector<64x128xf32>,
    return
  }
  func.func @transform_0(%arg0: i32, %arg1: i32) -> (i32, i32) {
    %c1_i32 = arith.constant 1 : i32
    %0 = arith.muli %arg0, %c1_i32 : i32
    %1 = arith.addi %0, %arg1 : i32
    %c0_i32 = arith.constant 0 : i32
    %c0_i32_0 = arith.constant 0 : i32
    return %1, %c0_i32 : i32, i32
  }
  func.func @transform_1(%arg0: i32, %arg1: i32) -> (i32, i32) {
    %c0_i32 = arith.constant 0 : i32
    %c0_i32_0 = arith.constant 0 : i32
    %c0_i32_1 = arith.constant 0 : i32
    return %c0_i32, %c0_i32_0 : i32, i32
  }
  func.func @transform_2(%arg0: i32, %arg1: i32) -> (i32, i32) {
    %c0_i32 = arith.constant 0 : i32
    %c0_i32_0 = arith.constant 0 : i32
    %c0_i32_1 = arith.constant 0 : i32
    return %c0_i32, %c0_i32_0 : i32, i32
  }
  func.func @transform_3(%arg0: i32, %arg1: i32) -> (i32, i32) {
    %c0_i32 = arith.constant 0 : i32
    %c0_i32_0 = arith.constant 0 : i32
    %c0_i32_1 = arith.constant 0 : i32
    return %c0_i32, %c0_i32_0 : i32, i32
  }
  func.func @transform_4(%arg0: i32, %arg1: i32) -> (i32, i32) {
    %c0_i32 = arith.constant 0 : i32
    %c0_i32_0 = arith.constant 0 : i32
    %c0_i32_1 = arith.constant 0 : i32
    return %c0_i32, %c0_i32_0 : i32, i32
  }
  func.func @transform_5(%arg0: i32, %arg1: i32) -> (i32, i32) {
    %c0_i32 = arith.constant 0 : i32
    %c0_i32_0 = arith.constant 0 : i32
    %c0_i32_1 = arith.constant 0 : i32
    return %c0_i32, %c0_i32_0 : i32, i32
  }
  func.func @transform_6(%arg0: i32, %arg1: i32) -> (i32, i32) {
    %c0_i32 = arith.constant 0 : i32
    %c0_i32_0 = arith.constant 0 : i32
    %c0_i32_1 = arith.constant 0 : i32
    return %c0_i32, %c0_i32_0 : i32, i32
  }
  func.func @transform_7(%arg0: i32, %arg1: i32) -> (i32, i32) {
    %c0_i32 = arith.constant 0 : i32
    %c0_i32_0 = arith.constant 0 : i32
    %c0_i32_1 = arith.constant 0 : i32
    return %c0_i32, %c0_i32_0 : i32, i32
  }
  func.func @transform_8(%arg0: i32, %arg1: i32) -> (i32, i32) {
    %c0_i32 = arith.constant 0 : i32
    %c0_i32_0 = arith.constant 0 : i32
    %c0_i32_1 = arith.constant 0 : i32
    return %c0_i32, %c0_i32_0 : i32, i32
  }
  func.func @transform_9(%arg0: i32, %arg1: i32) -> (i32, i32) {
    %c1_i32 = arith.constant 1 : i32
    %0 = arith.muli %arg0, %c1_i32 : i32
    %1 = arith.addi %0, %arg1 : i32
    %c0_i32 = arith.constant 0 : i32
    %c0_i32_0 = arith.constant 0 : i32
    return %1, %c0_i32 : i32, i32
  }
}

</mosaic_0001>

<bundles_post_ra>
// kernel: tpu_custom_call.1
= control target key start
LH: loop header
LB: loop body
LE: loop exit
PB: predicated region body
PF: predicated region fallthrough
CT: control target
= control target key end

     0   :  { %14 = vsyncpa [#allocation7], 0  ;;  %s1483_s0 = inlined_call_operand.vmem [shape: f32[64,16], index: 0, kind: input, shape index: {}]   ;;  %s1484_s1 = inlined_call_operand.vmem [shape: f32[16,128], index: 1, kind: input, shape index: {}]   ;;  %s1485_s2 = inlined_call_operand.vmem [shape: f32[32,128], index: 2, kind: input, shape index: {}]   ;;  %s1486_s3 = inlined_call_operand.vmem [shape: f32[1,128], index: 3, kind: input, shape index: {}]   ;;  %s1487_s4 = inlined_call_operand.vmem [shape: f32[32,128], index: 4, kind: input, shape index: {}]   ;;  %s1488_s5 = inlined_call_operand.hbm [shape: f32[32,128], index: 5, kind: input, shape index: {}]   ;;  %s1489_s6 = inlined_call_operand.vmem [shape: f32[1,128], index: 6, kind: input, shape index: {}]   ;;  %s1490_s7 = inlined_call_operand.hbm [shape: f32[32,128], index: 7, kind: input, shape index: {}]   ;;  %s1491_s8 = inlined_call_operand.vmem [shape: f32[1,128], index: 8, kind: input, shape index: {}]   ;;  %s1492_s9 = inlined_call_operand.hbm [shape: f32[64,128], index: 9, kind: output, shape index: {}]  }
   0x1   :  { %15 = vsyncpa [#allocation10], 0 }
   0x2   :  { %16 = vsyncpa [#allocation8], 0  ;;  %s1254_s30 = smov [#allocation6]  }
   0x3   :  { %s40_s10 = sshll.u32 %s1254_s30, 4  ;;  %s41_s10 = int_to_ptr.vmem [resolvable:$true] %s40_s10 }
   0x4   :  { %s1148_s11 = scalar_lea.vmem %s41_s10, 512  ;;  %p1153_p1 = scmp.lt.s32.totalorder %s41_s10, %s41_s10 }
   0x5   :  { %p1149_p0 = scmp.ne.s32.totalorder %s41_s10, %s1148_s11  ;;  %p1154_p2 = scmp.lt.s32.totalorder %s1148_s11, %s1148_s11 }
   0x7   :  { %p1155_p3 = por %p1154_p2, %p1153_p1 }
   0x9   :  { %p1156_p4 = pnand %p1155_p3, %p1149_p0 }
   0xb   :  { %1159 = shalt.err (!%p1156_p4)
}
   0xc   :  { %s1255_s12 = smov 128   ;;  %s1256_s13 = smov 8  }
   0xd   :  { %46 = dma.hbm_to_vmem [thread:$0]  %s1488_s5, 512, %s41_s10, [#allocation7], %s1255_s12, %s1255_s12, %s1256_s13  }
   0xe   :  { %s1257_s16 = smov [#allocation9]  }
   0xf   :  { %s54_s17 = sshll.u32 %s1257_s16, 4  ;;  %s55_s17 = int_to_ptr.vmem [resolvable:$true] %s54_s17 }
  0x10   :  { %s1168_s18 = scalar_lea.vmem %s55_s17, 512  ;;  %p1173_p6 = scmp.lt.s32.totalorder %s55_s17, %s55_s17 }
  0x11   :  { %p1169_p5 = scmp.ne.s32.totalorder %s55_s17, %s1168_s18  ;;  %p1174_p7 = scmp.lt.s32.totalorder %s1168_s18, %s1168_s18 }
  0x13   :  { %p1175_p8 = por %p1174_p7, %p1173_p6 }
  0x15   :  { %p1176_p9 = pnand %p1175_p8, %p1169_p5 }
  0x17   :  { %1179 = shalt.err (!%p1176_p9)
}
  0x18   :  { %60 = dma.hbm_to_vmem [thread:$0]  %s1490_s7, 512, %s55_s17, [#allocation10], %s1255_s12, %s1255_s12, %s1256_s13  }
  0x19   :  { %1224 = dma.done.wait [#allocation7], 512  }
  0x1a   :  { %1225 = vsyncadd [#allocation7], 4294966784 }
  0x1b   :  { %1226 = dma.done.wait [#allocation10], 512  }
  0x1c   :  { %1227 = vsyncadd [#allocation10], 4294966784  ;;  %vm89_vm0 = vcmask 261120   ;;  %v1258_v0 = vmov 0.0   ;;  %v103_v1 = vld [vmem:[%s1484_s1 + $0x8] sm:$0xff]  ;;  %v102_v2 = vld [vmem:[%s1484_s1] sm:$0xff] }
  0x1d   :  { %90 = vst.msk [vmem:[#allocation4] sm:$0xff] %vm89_vm0, %v1258_v0  ;;  %91 = vst.msk [vmem:[#allocation4 + $0x8] sm:$0xff] %vm89_vm0, %v1258_v0  ;;  %962 = vmatprep.subr.mxu0 %v103_v1  ;;  %1040 = vmatprep.subr.mxu1 %v103_v1  ;;  %v94_v5 = vld [vmem:[%s1483_s0] sm:$0xff]  ;;  %vm111_vm1 = vcmask 130048   ;;  %v95_v7 = vld [vmem:[%s1483_s0 + $0x8] sm:$0xff] }
  0x1e   :  { %92 = vst.msk [vmem:[#allocation5] sm:$0xff] %vm89_vm0, %v1258_v0  ;;  %93 = vst.msk [vmem:[#allocation5 + $0x8] sm:$0xff] %vm89_vm0, %v1258_v0  ;;  %963 = vmatpush3.msra.mxu0 %v103_v1  ;;  %1042 = vmatpush3.msra.mxu1 %v103_v1  ;;  %v98_v6 = vld [vmem:[%s1483_s0 + $0x20] sm:$0xff]  ;;  %v99_v8 = vld [vmem:[%s1483_s0 + $0x28] sm:$0xff] }
  0x1f   :  { %964 = vmatprep.subr.mxu0 %v102_v2  ;;  %1041 = vmatprep.subr.mxu1 %v102_v2  ;;  %v96_v9 = vld [vmem:[%s1483_s0 + $0x10] sm:$0xff]  ;;  %v97_v11 = vld [vmem:[%s1483_s0 + $0x18] sm:$0xff]  ;;  %v885_v13 = vld [vmem:[%s1486_s3] ss:$0 sm:$0xff] }
  0x20   :  { %965 = vmatpush3.msra.mxu0 %v102_v2  ;;  %1043 = vmatpush3.msra.mxu1 %v102_v2  ;;  %v100_v10 = vld [vmem:[%s1483_s0 + $0x30] sm:$0xff]  ;;  %v101_v12 = vld [vmem:[%s1483_s0 + $0x38] sm:$0xff]  ;;  %s1381_s0 = smov 0  }
  0x21   :  { %966 = vmatprep.mubr.msk.f32.mxu0 %vm111_vm1, %v94_v5  ;;  %972 = vmatprep.mubr.msk.f32.mxu1 %vm111_vm1, %v98_v6 }
  0x22   :  { %967 = vmatmul.mubr.msk.f32.vlgmr.msra.gmra.mxu0 %vm111_vm1, %v95_v7  ;;  %973 = vmatmul.mubr.msk.f32.vlgmr.msra.gmra.mxu1 %vm111_vm1, %v99_v8 }
  0x23   :  { %969 = vmatprep.mubr.msk.f32.mxu0 %vm111_vm1, %v96_v9  ;;  %975 = vmatprep.mubr.msk.f32.mxu1 %vm111_vm1, %v100_v10 }
  0x24   :  { %v249_v3 = vld [vmem:[#allocation4] sm:$0xff]  }
  0x25   :  { %v250_v4 = vld [vmem:[#allocation5] sm:$0xff]  }
  0x26   :  { %970 = vmatmul.mubr.msk.f32.gmra.mxu0 %vm111_vm1, %v97_v11  ;;  %976 = vmatmul.mubr.msk.f32.gmra.mxu1 %vm111_vm1, %v101_v12 }
  0xe2   :  { %v968_v14 = vpop.f32.mrf.mxu0  ;;  %v974_v15 = vpop.f32.mrf.mxu1 }
  0xe3   :  { %v208_v16 = vadd.f32 %v968_v14, %v885_v13  ;;  %v228_v17 = vadd.f32 %v974_v15, %v885_v13 }
  0xe4   :  { %v202_v18 = vpop.f32.mrf.mxu0  ;;  %v222_v19 = vpop.f32.mrf.mxu1 }
  0xe5   :  { %242 = vst [vmem:[#allocation2 + $0x8] sm:$0xff] %v208_v16  ;;  %246 = vst [vmem:[#allocation2 + $0x28] sm:$0xff] %v228_v17  ;;  %v203_v20 = vadd.f32 %v885_v13, %v202_v18  ;;  %v223_v21 = vadd.f32 %v885_v13, %v222_v19 }
  0xe6   :  { %v971_v22 = vpop.f32.mrf.mxu0  ;;  %v977_v23 = vpop.f32.mrf.mxu1 }
  0xe7   :  { %241 = vst [vmem:[#allocation2] sm:$0xff] %v203_v20  ;;  %245 = vst [vmem:[#allocation2 + $0x20] sm:$0xff] %v223_v21  ;;  %v218_v24 = vadd.f32 %v971_v22, %v885_v13  ;;  %v238_v25 = vadd.f32 %v977_v23, %v885_v13 }
  0xe8   :  { %v212_v26 = vpop.f32.mrf.mxu0  ;;  %v232_v27 = vpop.f32.mrf.mxu1 }
  0xe9   :  { %244 = vst [vmem:[#allocation2 + $0x18] sm:$0xff] %v218_v24  ;;  %248 = vst [vmem:[#allocation2 + $0x38] sm:$0xff] %v238_v25  ;;  %v213_v28 = vadd.f32 %v885_v13, %v212_v26  ;;  %v233_v29 = vadd.f32 %v885_v13, %v232_v27 }
  0xeb   :  { %243 = vst [vmem:[#allocation2 + $0x10] sm:$0xff] %v213_v28  ;;  %247 = vst [vmem:[#allocation2 + $0x30] sm:$0xff] %v233_v29 }
  0xec LB: > { %v265_v30 = vld [vmem:[%s1485_s2 + $0x18] sm:$0xff]  ;;  %v1259_v31 = vmov 0.0   ;;  %v264_v32 = vld [vmem:[%s1485_s2 + $0x10] sm:$0xff]  ;;  %vm1260_vm2 = vmmov 0   ;;  %v263_v33 = vld [vmem:[%s1485_s2 + $0x8] sm:$0xff]  ;;  %s894_s26 = sshll.u32 %s1240_s0, 3  ;;  %s1240_s0 = sphi %s1381_s0, %s256_s0   ;;  %v1236_v3 = vphi %v249_v3, %v1494_v3   ;;  %v1232_v4 = vphi %v250_v4, %v1493_v4  }
  0xed   : > { %978 = vmatprep.subr.mxu0 %v1259_v31  ;;  %986 = vmatprep.mubr.msk.f32.mxu0 %vm1260_vm2, %v1259_v31  ;;  %v262_v34 = vld [vmem:[%s1485_s2] sm:$0xff]  ;;  %s260_s27 = scalar_lea.vmem [#allocation2], %s894_s26  ;;  %s1261_s28 = smov 32  }
  0xee   : > { %979 = vmatpush3.msra.mxu0 %v265_v30  ;;  %s1262_s1 = smov 96   ;;  %s1263_s29 = smov 64  }
  0xef   : > { %980 = vmatprep.subr.mxu0 %v1259_v31  ;;  %s373_s30 = scalar_lea.vmem [#allocation3], %s894_s26  ;;  %s256_s0 = sadd.s32 1, %s1240_s0  }
  0xf0   : > { %981 = vmatpush3.msra.mxu0 %v264_v32  ;;  %p253_p10 = scmp.ge.s32.totalorder %s256_s0, 8  }
  0xf1   : > { %982 = vmatprep.subr.mxu0 %v1259_v31  ;;  %v393_v55 = vld [vmem:[%s1487_s4 + $0x18] sm:$0xff] (%p253_p10)  ;;  %v392_v56 = vld [vmem:[%s1487_s4 + $0x10] sm:$0xff] (%p253_p10)  ;;  %v391_v57 = vld [vmem:[%s1487_s4 + $0x8] sm:$0xff] (%p253_p10) }
  0xf2   : > { %983 = vmatpush3.msra.mxu0 %v263_v33  ;;  %v261_v35 = vld [vmem:[%s260_s27] sm:$0xff]  ;;  %1044 = vmatprep.subr.mxu1 (%p253_p10), %v393_v55 }
  0xf3   : > { %984 = vmatprep.subr.mxu0 %v1259_v31  ;;  %1048 = vmatpush3.msra.mxu1 (%p253_p10), %v393_v55  ;;  %v390_v58 = vld [vmem:[%s1487_s4] sm:$0xff] (%p253_p10) }
  0xf4   : > { %985 = vmatpush3.msra.mxu0 %v262_v34  ;;  %1045 = vmatprep.subr.mxu1 (%p253_p10), %v392_v56  ;;  %v897_v5 = vld [vmem:[%s1489_s6] ss:$0 sm:$0xff] (%p253_p10)  ;;  %s1443_s6 = smov (%p253_p10), 0  }
  0xf5   : > { %987 = vmatmul.mubr.msk.f32.vlgmr.msra.gmra.mxu0 %vm89_vm0, %v1236_v3  ;;  %989 = vmatprep.subr.mxu0 (%p253_p10), %v393_v55 }
  0xf6   :  { %990 = vmatpush3.msra.mxu0 (%p253_p10), %v393_v55  ;;  %1049 = vmatpush3.msra.mxu1 (%p253_p10), %v392_v56 }
  0xf7   :  { %991 = vmatprep.subr.mxu0 (%p253_p10), %v392_v56  ;;  %1046 = vmatprep.subr.mxu1 (%p253_p10), %v391_v57 }
  0xf8   :  { %992 = vmatpush3.msra.mxu0 (%p253_p10), %v392_v56  ;;  %1050 = vmatpush3.msra.mxu1 (%p253_p10), %v391_v57 }
  0xf9   :  { %993 = vmatprep.subr.mxu0 (%p253_p10), %v391_v57  ;;  %1047 = vmatprep.subr.mxu1 (%p253_p10), %v390_v58 }
  0xfa   :  { %994 = vmatpush3.msra.mxu0 (%p253_p10), %v391_v57  ;;  %1051 = vmatpush3.msra.mxu1 (%p253_p10), %v390_v58 }
  0xfb   :  { %995 = vmatprep.subr.mxu0 (%p253_p10), %v390_v58 }
  0xfc   :  { %996 = vmatpush3.msra.mxu0 (%p253_p10), %v390_v58 }
 0x1b5   : > { %v336_v36 = vpop.f32.mrf.mxu0 }
 0x1b6   : > { %v340_v37 = vadd.f32 %v336_v36, %v261_v35 }
 0x1b7   : > { %v988_v38 = vpop.f32.mrf.mxu0 }
 0x1b8   : > { %1124 = vtanh.f32 %v340_v37  ;;  %v896_v40 = vmul.f32 -1.442695, %v340_v37 }
 0x1ba   : > { %1126 = vpow2.f32 %v896_v40 }
 0x1c5   : > { %v1125_v39 = vpop.eup %1124 }
 0x1c6   : > { %354 = vrot.lane.b32.xlu0 %v1125_v39, %s1261_s28 }
 0x1c7   : > { %v1127_v41 = vpop.eup %1126 }
 0x1c8   : > { %v344_v42 = vadd.f32 1.0, %v1127_v41 }
 0x1ca   : > { %349 = vrot.lane.b32.xlu0 %v1232_v4, %s1261_s28  ;;  %1128 = vrcp.f32 %v344_v42 }
 0x1d7   : > { %v1129_v43 = vpop.eup %1128 }
 0x238   : > { %v355_v44 = vpop.permute.xlu0 %354 }
 0x239   : > { %v357_v45 = vmul.f32 %v1129_v43, %v355_v44 }
 0x23b   : > { %359 = vrot.lane.b32.xlu1 %v357_v45, %s1261_s28 }
 0x23c   : > { %v350_v46 = vpop.permute.xlu0 %349 }
 0x23d   : > { %v352_v47 = vmul.f32 %v1129_v43, %v350_v46 }
 0x2ad   : > { %v360_v48 = vpop.permute.xlu1 %359 }
 0x2ae   : > { %v362_v49 = vadd.f32 %v360_v48, %v352_v47 }
 0x2b0   : > { %1130 = vtanh.f32 %v362_v49 }
 0x2bd   : > { %v1131_v50 = vpop.eup %1130 }
 0x2be   : > { %365 = vrot.lane.b32.xlu1 %v1131_v50, %s1261_s28 }
 0x2c2   : > { %376 = vrot.lane.b32.xlu1 %v362_v49, %s1262_s1 }
 0x330   : > { %v366_v51 = vpop.permute.xlu1 %365 }
 0x331   : > { %v368_v52 = vmul.f32 %v1129_v43, %v366_v51 }
 0x333   : > { %370 = vrot.lane.b32.xlu0 %v368_v52, %s1263_s29 }
 0x334   : > { %v377_v53 = vpop.permute.xlu1 %376  }
 0x335   : > { %v1493_v4 = vmov %v377_v53  ;;  %381 = vst.msk [vmem:[#allocation5] sm:$0xff] (%p253_p10), %vm89_vm0, %v377_v53 }
 0x336   :  { %v541_v4 = vld [vmem:[#allocation5 + $0x8] sm:$0xff] (%p253_p10)  }
 0x3a2   :  { %255 = sbr.rel (!%p253_p10) target bundleno = 236 (0xec), region = 92 }
 0x3a5   : > { %v371_v54 = vpop.permute.xlu0 %370  }
 0x3a6   : > { %374 = vst.msk [vmem:[%s373_s30] sm:$0xff] %vm89_vm0, %v371_v54  ;;  %v1494_v3 = vmov %v371_v54  ;;  %380 = vst.msk [vmem:[#allocation4] sm:$0xff] (%p253_p10), %vm89_vm0, %v371_v54 }
 0x3a7   :  { %v539_v3 = vld [vmem:[#allocation4 + $0x8] sm:$0xff]  }
 0x3ad   :  { %v382_v59 = vld [vmem:[#allocation3] sm:$0xff]  ;;  %v383_v61 = vld [vmem:[#allocation3 + $0x8] sm:$0xff]  ;;  %v384_v63 = vld [vmem:[#allocation3 + $0x10] sm:$0xff] }
 0x3ae   :  { %v386_v60 = vld [vmem:[#allocation3 + $0x20] sm:$0xff]  ;;  %v387_v62 = vld [vmem:[#allocation3 + $0x28] sm:$0xff]  ;;  %v388_v0 = vld [vmem:[#allocation3 + $0x30] sm:$0xff]  ;;  %997 = vmatprep.mubr.msk.f32.mxu0 %vm89_vm0, %v382_v59 }
 0x3af   :  { %1003 = vmatprep.mubr.msk.f32.mxu1 %vm89_vm0, %v386_v60  ;;  %998 = vmatmul.mubr.msk.f32.vlgmr.msra.gmra.mxu0 %vm89_vm0, %v383_v61  ;;  %v385_v1 = vld [vmem:[#allocation3 + $0x18] sm:$0xff] }
 0x3b0   :  { %1004 = vmatmul.mubr.msk.f32.vlgmr.msra.gmra.mxu1 %vm89_vm0, %v387_v62  ;;  %1000 = vmatprep.mubr.msk.f32.mxu0 %vm89_vm0, %v384_v63  ;;  %v389_v2 = vld [vmem:[#allocation3 + $0x38] sm:$0xff] }
 0x3b1   :  { %1006 = vmatprep.mubr.msk.f32.mxu1 %vm89_vm0, %v388_v0 }
 0x3b3   :  { %1001 = vmatmul.mubr.msk.f32.gmra.mxu0 %vm89_vm0, %v385_v1 }
 0x3b4   :  { %1007 = vmatmul.mubr.msk.f32.gmra.mxu1 %vm89_vm0, %v389_v2 }
 0x46f   :  { %v999_v6 = vpop.f32.mrf.mxu0 }
 0x470   :  { %v1005_v7 = vpop.f32.mrf.mxu1  ;;  %v497_v8 = vadd.f32 %v999_v6, %v897_v5 }
 0x471   :  { %v517_v9 = vadd.f32 %v1005_v7, %v897_v5  ;;  %v491_v10 = vpop.f32.mrf.mxu0 }
 0x472   :  { %v511_v11 = vpop.f32.mrf.mxu1  ;;  %531 = vst [vmem:[#allocation2 + $0x8] sm:$0xff] %v497_v8  ;;  %v492_v12 = vadd.f32 %v897_v5, %v491_v10 }
 0x473   :  { %535 = vst [vmem:[#allocation2 + $0x28] sm:$0xff] %v517_v9  ;;  %v512_v13 = vadd.f32 %v897_v5, %v511_v11  ;;  %v1002_v14 = vpop.f32.mrf.mxu0 }
 0x474   :  { %v1008_v15 = vpop.f32.mrf.mxu1  ;;  %530 = vst [vmem:[#allocation2] sm:$0xff] %v492_v12  ;;  %v507_v16 = vadd.f32 %v1002_v14, %v897_v5 }
 0x475   :  { %534 = vst [vmem:[#allocation2 + $0x20] sm:$0xff] %v512_v13  ;;  %v527_v17 = vadd.f32 %v1008_v15, %v897_v5  ;;  %v501_v18 = vpop.f32.mrf.mxu0 }
 0x476   :  { %v521_v19 = vpop.f32.mrf.mxu1  ;;  %533 = vst [vmem:[#allocation2 + $0x18] sm:$0xff] %v507_v16  ;;  %v502_v20 = vadd.f32 %v897_v5, %v501_v18 }
 0x477   :  { %537 = vst [vmem:[#allocation2 + $0x38] sm:$0xff] %v527_v17  ;;  %v522_v21 = vadd.f32 %v897_v5, %v521_v19 }
 0x478   :  { %532 = vst [vmem:[#allocation2 + $0x10] sm:$0xff] %v502_v20 }
 0x479   :  { %536 = vst [vmem:[#allocation2 + $0x30] sm:$0xff] %v522_v21 }
 0x47a LB: > { %v556_v22 = vld [vmem:[#allocation6 + $0x18] sm:$0xff]  ;;  %v1264_v23 = vmov 0.0   ;;  %v555_v24 = vld [vmem:[#allocation6 + $0x10] sm:$0xff]  ;;  %vm1265_vm3 = vmmov 0   ;;  %v554_v25 = vld [vmem:[#allocation6 + $0x8] sm:$0xff]  ;;  %s906_s20 = sshll.u32 %s1252_s6, 3  ;;  %s1252_s6 = sphi %s1443_s6, %s547_s6   ;;  %v1248_v3 = vphi %v539_v3, %v1496_v3   ;;  %v1244_v4 = vphi %v541_v4, %v1495_v4  }
 0x47b   : > { %1009 = vmatprep.subr.mxu0 %v1264_v23  ;;  %1017 = vmatprep.mubr.msk.f32.mxu0 %vm1265_vm3, %v1264_v23  ;;  %v553_v26 = vld [vmem:[#allocation6] sm:$0xff]  ;;  %s551_s0 = scalar_lea.vmem [#allocation2], %s906_s20  ;;  %s1266_s3 = smov 32  }
 0x47c   : > { %1010 = vmatpush3.msra.mxu0 %v556_v22  ;;  %s1267_s5 = smov 96   ;;  %s1268_s21 = smov 64  }
 0x47d   : > { %1011 = vmatprep.subr.mxu0 %v1264_v23  ;;  %s663_s22 = scalar_lea.vmem [#allocation3], %s906_s20  ;;  %s547_s6 = sadd.s32 1, %s1252_s6  }
 0x47e   : > { %1012 = vmatpush3.msra.mxu0 %v555_v24  ;;  %p544_p11 = scmp.ge.s32.totalorder %s547_s6, 8  }
 0x47f   : > { %1013 = vmatprep.subr.mxu0 %v1264_v23  ;;  %v674_v47 = vld [vmem:[#allocation9 + $0x18] sm:$0xff] (%p544_p11)  ;;  %v673_v48 = vld [vmem:[#allocation9 + $0x10] sm:$0xff] (%p544_p11)  ;;  %v672_v49 = vld [vmem:[#allocation9 + $0x8] sm:$0xff] (%p544_p11)  ;;  %s1269_s24 = smov (%p544_p11), [#allocation11]  }
 0x480   : > { %1014 = vmatpush3.msra.mxu0 %v554_v25  ;;  %v552_v27 = vld [vmem:[%s551_s0] sm:$0xff]  ;;  %1052 = vmatprep.subr.mxu1 (%p544_p11), %v674_v47  ;;  %s836_s25 = sshll.u32 (%p544_p11), %s1269_s24, 4  ;;  %s837_s25 = int_to_ptr.vmem [resolvable:$true] %s836_s25 }
 0x481   : > { %1015 = vmatprep.subr.mxu0 %v1264_v23  ;;  %1056 = vmatpush3.msra.mxu1 (%p544_p11), %v674_v47  ;;  %v671_v50 = vld [vmem:[#allocation9] sm:$0xff] (%p544_p11)  ;;  %p1185_p13 = scmp.lt.s32.totalorder (%p544_p11), %s837_s25, %s837_s25 }
 0x482   : > { %1016 = vmatpush3.msra.mxu0 %v553_v26  ;;  %1053 = vmatprep.subr.mxu1 (%p544_p11), %v673_v48  ;;  %v909_v59 = vld [vmem:[%s1491_s8] ss:$0 sm:$0xff] (%p544_p11)  ;;  %s1180_s8 = scalar_lea.vmem (%p544_p11), %s837_s25, 1024 }
 0x483   : > { %1018 = vmatmul.mubr.msk.f32.vlgmr.msra.gmra.mxu0 %vm89_vm0, %v1248_v3  ;;  %1020 = vmatprep.subr.mxu0 (%p544_p11), %v674_v47  ;;  %p1181_p12 = scmp.ne.s32.totalorder (%p544_p11), %s837_s25, %s1180_s8  ;;  %p1186_p0 = scmp.lt.s32.totalorder (%p544_p11), %s1180_s8, %s1180_s8 }
 0x484   :  { %1021 = vmatpush3.msra.mxu0 (%p544_p11), %v674_v47  ;;  %1057 = vmatpush3.msra.mxu1 (%p544_p11), %v673_v48 }
 0x485   :  { %1022 = vmatprep.subr.mxu0 (%p544_p11), %v673_v48  ;;  %1054 = vmatprep.subr.mxu1 (%p544_p11), %v672_v49  ;;  %p1187_p1 = por (%p544_p11), %p1186_p0, %p1185_p13 }
 0x486   :  { %1023 = vmatpush3.msra.mxu0 (%p544_p11), %v673_v48  ;;  %1058 = vmatpush3.msra.mxu1 (%p544_p11), %v672_v49 }
 0x487   :  { %1024 = vmatprep.subr.mxu0 (%p544_p11), %v672_v49  ;;  %1055 = vmatprep.subr.mxu1 (%p544_p11), %v671_v50  ;;  %p1188_p2 = pnand (%p544_p11), %p1187_p1, %p1181_p12 }
 0x488   :  { %1025 = vmatpush3.msra.mxu0 (%p544_p11), %v672_v49  ;;  %1059 = vmatpush3.msra.mxu1 (%p544_p11), %v671_v50 }
 0x489   :  { %1026 = vmatprep.subr.mxu0 (%p544_p11), %v671_v50 }
 0x48a   :  { %1027 = vmatpush3.msra.mxu0 (%p544_p11), %v671_v50 }
 0x543   : > { %v626_v28 = vpop.f32.mrf.mxu0 }
 0x544   : > { %v630_v29 = vadd.f32 %v626_v28, %v552_v27 }
 0x545   : > { %v1019_v30 = vpop.f32.mrf.mxu0 }
 0x546   : > { %1132 = vtanh.f32 %v630_v29  ;;  %v908_v32 = vmul.f32 -1.442695, %v630_v29 }
 0x548   : > { %1134 = vpow2.f32 %v908_v32 }
 0x553   : > { %v1133_v31 = vpop.eup %1132 }
 0x554   : > { %644 = vrot.lane.b32.xlu0 %v1133_v31, %s1266_s3 }
 0x555   : > { %v1135_v33 = vpop.eup %1134 }
 0x556   : > { %v634_v34 = vadd.f32 1.0, %v1135_v33 }
 0x558   : > { %639 = vrot.lane.b32.xlu0 %v1244_v4, %s1266_s3  ;;  %1136 = vrcp.f32 %v634_v34 }
 0x565   : > { %v1137_v35 = vpop.eup %1136 }
 0x5c6   : > { %v645_v36 = vpop.permute.xlu0 %644 }
 0x5c7   : > { %v647_v37 = vmul.f32 %v1137_v35, %v645_v36 }
 0x5c9   : > { %649 = vrot.lane.b32.xlu1 %v647_v37, %s1266_s3 }
 0x5ca   : > { %v640_v38 = vpop.permute.xlu0 %639 }
 0x5cb   : > { %v642_v39 = vmul.f32 %v1137_v35, %v640_v38 }
 0x63b   : > { %v650_v40 = vpop.permute.xlu1 %649 }
 0x63c   : > { %v652_v41 = vadd.f32 %v650_v40, %v642_v39 }
 0x63e   : > { %1138 = vtanh.f32 %v652_v41 }
 0x64b   : > { %v1139_v42 = vpop.eup %1138 }
 0x64c   : > { %655 = vrot.lane.b32.xlu1 %v1139_v42, %s1266_s3 }
 0x650   : > { %666 = vrot.lane.b32.xlu1 %v652_v41, %s1267_s5 }
 0x6be   : > { %v656_v43 = vpop.permute.xlu1 %655 }
 0x6bf   : > { %v658_v44 = vmul.f32 %v1137_v35, %v656_v43 }
 0x6c1   : > { %660 = vrot.lane.b32.xlu0 %v658_v44, %s1268_s21 }
 0x6c2   : > { %v667_v45 = vpop.permute.xlu1 %666  }
 0x6c3   : > { %v1495_v4 = vmov %v667_v45  ;;  %670 = vst.msk [vmem:[#allocation5 + $0x8] sm:$0xff] (%p544_p11), %vm89_vm0, %v667_v45 }
 0x730   :  { %546 = sbr.rel (!%p544_p11) target bundleno = 1146 (0x47a), region = 103 }
 0x733   : > { %v661_v46 = vpop.permute.xlu0 %660  }
 0x734   : > { %664 = vst.msk [vmem:[%s663_s22] sm:$0xff] %vm89_vm0, %v661_v46  ;;  %v1496_v3 = vmov %v661_v46  ;;  %669 = vst.msk [vmem:[#allocation4 + $0x8] sm:$0xff] (%p544_p11), %vm89_vm0, %v661_v46 }
 0x73b   :  { %v675_v51 = vld [vmem:[#allocation3] sm:$0xff]  ;;  %v676_v53 = vld [vmem:[#allocation3 + $0x8] sm:$0xff]  ;;  %v677_v55 = vld [vmem:[#allocation3 + $0x10] sm:$0xff] }
 0x73c   :  { %v679_v52 = vld [vmem:[#allocation3 + $0x20] sm:$0xff]  ;;  %v680_v54 = vld [vmem:[#allocation3 + $0x28] sm:$0xff]  ;;  %v681_v56 = vld [vmem:[#allocation3 + $0x30] sm:$0xff]  ;;  %1028 = vmatprep.mubr.msk.f32.mxu0 %vm89_vm0, %v675_v51 }
 0x73d   :  { %1034 = vmatprep.mubr.msk.f32.mxu1 %vm89_vm0, %v679_v52  ;;  %1029 = vmatmul.mubr.msk.f32.vlgmr.msra.gmra.mxu0 %vm89_vm0, %v676_v53  ;;  %v678_v57 = vld [vmem:[#allocation3 + $0x18] sm:$0xff] }
 0x73e   :  { %1035 = vmatmul.mubr.msk.f32.vlgmr.msra.gmra.mxu1 %vm89_vm0, %v680_v54  ;;  %1031 = vmatprep.mubr.msk.f32.mxu0 %vm89_vm0, %v677_v55  ;;  %v682_v58 = vld [vmem:[#allocation3 + $0x38] sm:$0xff] }
 0x73f   :  { %1037 = vmatprep.mubr.msk.f32.mxu1 %vm89_vm0, %v681_v56 }
 0x741   :  { %1032 = vmatmul.mubr.msk.f32.gmra.mxu0 %vm89_vm0, %v678_v57 }
 0x742   :  { %1038 = vmatmul.mubr.msk.f32.gmra.mxu1 %vm89_vm0, %v682_v58 }
 0x7fd   :  { %v1030_v60 = vpop.f32.mrf.mxu0 }
 0x7fe   :  { %v1036_v61 = vpop.f32.mrf.mxu1  ;;  %v786_v62 = vadd.f32 %v1030_v60, %v909_v59 }
 0x7ff   :  { %v806_v63 = vadd.f32 %v1036_v61, %v909_v59  ;;  %v780_v0 = vpop.f32.mrf.mxu0 }
 0x800   :  { %v800_v1 = vpop.f32.mrf.mxu1  ;;  %820 = vst [vmem:[#allocation11 + $0x8] sm:$0xff] %v786_v62  ;;  %v781_v2 = vadd.f32 %v909_v59, %v780_v0 }
 0x801   :  { %824 = vst [vmem:[#allocation11 + $0x28] sm:$0xff] %v806_v63  ;;  %v801_v3 = vadd.f32 %v909_v59, %v800_v1  ;;  %v1033_v4 = vpop.f32.mrf.mxu0 }
 0x802   :  { %v1039_v5 = vpop.f32.mrf.mxu1  ;;  %819 = vst [vmem:[#allocation11] sm:$0xff] %v781_v2  ;;  %v796_v6 = vadd.f32 %v1033_v4, %v909_v59 }
 0x803   :  { %823 = vst [vmem:[#allocation11 + $0x20] sm:$0xff] %v801_v3  ;;  %v816_v7 = vadd.f32 %v1039_v5, %v909_v59  ;;  %v790_v8 = vpop.f32.mrf.mxu0 }
 0x804   :  { %v810_v9 = vpop.f32.mrf.mxu1  ;;  %822 = vst [vmem:[#allocation11 + $0x18] sm:$0xff] %v796_v6  ;;  %v791_v10 = vadd.f32 %v909_v59, %v790_v8 }
 0x805   :  { %826 = vst [vmem:[#allocation11 + $0x38] sm:$0xff] %v816_v7  ;;  %v811_v11 = vadd.f32 %v909_v59, %v810_v9 }
 0x806   :  { %821 = vst [vmem:[#allocation11 + $0x10] sm:$0xff] %v791_v10 }
 0x807   :  { %825 = vst [vmem:[#allocation11 + $0x30] sm:$0xff] %v811_v11 }
 0x808   :  { %1191 = shalt.err (!%p1188_p2)
}
 0x809   :  { %842 = dma.vmem_to_hbm [thread:$0]  %s837_s25, 1024, %s1492_s9, [#allocation8], %s1255_s12, %s1255_s12, %s1256_s13  }
 0x80a   :  { %1228 = dma.done.wait [#allocation8], 1024  }
 0x80b   :  { %1229 = vsyncadd [#allocation8], 4294966272 }
 0x80c   :  { %846 = vsyncpa [#allocation7], 1 }
 0x80d   :  { %847 = vsyncpa [#allocation10], 1 }
 0x80e   :  { %848 = vsyncpa [#allocation8], 1 }

</bundles_post_ra>
